<compile_context>
chip_gen: v7x
topology: tpu7x:2x2x1
jax: 0.10.0
libtpu: 0.0.40
codegen_flags: <defaults>
</compile_context>

<pallas_src>
import functools

import jax
import jax.numpy as jnp
from jax import lax
from jax.experimental import pallas as pl
from jax.experimental.pallas import tpu as pltpu

LANE = 128
CHUNK_ROWS = 512            # in-kernel accumulation chunk: (512,128) f32 = 256 KiB
MAX_BLOCK_ROWS = 8192       # (8192,128) f32 = 4 MiB per input pipeline buffer


def _round_up(x, m):
    return -(-x // m) * m


def _pow_half_integer(t, p):
    """t ** p for 2*p integer, |p| <= 8, t > 0: repeated squaring + at most one
    sqrt and one reciprocal (no exp+log power)."""
    ap = abs(p)
    ip = int(ap)
    half = (ap - ip) == 0.5
    res = None
    base = t
    k = ip
    while k:
        if k & 1:
            res = base if res is None else res * base
        k >>= 1
        if k:
            base = base * base
    if half:
        s = jnp.sqrt(t)
        res = s if res is None else res * s
    if res is None:
        res = jnp.ones_like(t)
    if p < 0:
        res = 1.0 / res
    return res


def _barron_loss(diff, alpha, scale, max_val):
    """Barron general robust loss, elementwise (alpha/scale/max are trace-time statics)."""
    z = diff * (1.0 / scale)
    z2 = z * z
    if alpha == 2.0:
        loss = 0.5 * z2
    elif alpha == 0.0:
        loss = jnp.log(0.5 * z2 + 1.0)
    else:
        beta = abs(alpha - 2.0)
        t = z2 * (1.0 / beta) + 1.0
        p = alpha * 0.5
        if float(alpha).is_integer() and abs(alpha) <= 16.0:
            pw = _pow_half_integer(t, p)          # power-free fast path
        else:
            pw = jnp.power(t, p)                  # generic: exp+log
        loss = (beta / alpha) * (pw - 1.0)
    if max_val is not None:
        loss = jnp.minimum(loss, jnp.float32(max_val))
    return loss


def _alpha_transcendentals(alpha):
    """Per-element transcendental count (for the XLA cost estimate)."""
    if alpha == 2.0:
        return 0
    if alpha == 0.0:
        return 1
    if float(alpha).is_integer() and abs(alpha) <= 16.0:
        return (1 if int(alpha) % 2 != 0 else 0) + (1 if alpha < 0 else 0)
    return 2


def _partial_sum_kernel(pred_ref, targ_ref, out_ref, *, alpha, scale, max_val,
                        mask_rows, rows_valid, block_rows, chunk_rows):
    nchunks = block_rows // chunk_rows
    base_row = pl.program_id(0) * block_rows

    def chunk_sum(c, masked):
        start = c * chunk_rows
        if not isinstance(start, int):
            start = pl.multiple_of(start, chunk_rows)
        diff = (pred_ref[pl.ds(start, chunk_rows), :].astype(jnp.float32)
                - targ_ref[pl.ds(start, chunk_rows), :].astype(jnp.float32))
        loss = _barron_loss(diff, alpha, scale, max_val)
        if masked:
            row = lax.broadcasted_iota(jnp.int32, loss.shape, 0)
            loss = jnp.where(base_row + start + row < rows_valid, loss, 0.0)
        # (chunk,128) -> (chunk//8, 8, 128) groups whole vregs; sum(axis=0) is
        # pure VPU vreg adds (no XLU cross-lane reduce in the hot loop) and the
        # chunked loop keeps VMEM temporaries at <= 256 KiB.
        return loss.reshape(chunk_rows // 8, 8, LANE).sum(axis=0)

    def accumulate(masked):
        if nchunks == 1:
            return chunk_sum(0, masked)
        return lax.fori_loop(
            0, nchunks,
            lambda c, acc: acc + chunk_sum(c, masked),
            jnp.zeros((8, LANE), jnp.float32),
            unroll=True)

    if not mask_rows:
        out_ref[...] = accumulate(False)
    else:
        # Only the last grid block can contain Pallas-padded (undefined) rows;
        # every other block skips the iota/compare/select entirely.
        last = pl.num_programs(0) - 1

        @pl.when(pl.program_id(0) != last)
        def _():
            out_ref[...] = accumulate(False)

        @pl.when(pl.program_id(0) == last)
        def _():
            out_ref[...] = accumulate(True)


def _elementwise_kernel(pred_ref, targ_ref, out_ref, *, alpha, scale, max_val,
                        block_rows, chunk_rows):
    nchunks = block_rows // chunk_rows

    def do_chunk(c):
        start = c * chunk_rows
        if not isinstance(start, int):
            start = pl.multiple_of(start, chunk_rows)
        diff = (pred_ref[pl.ds(start, chunk_rows), :].astype(jnp.float32)
                - targ_ref[pl.ds(start, chunk_rows), :].astype(jnp.float32))
        out_ref[pl.ds(start, chunk_rows), :] = _barron_loss(
            diff, alpha, scale, max_val).astype(out_ref.dtype)

    if nchunks == 1:
        do_chunk(0)
    else:
        @pl.loop(0, nchunks)
        def _(c):
            do_chunk(c)


def _pick_block_rows(rows, sub):
    """Largest practical block (amortize per-step overhead) while keeping >=2
    grid steps for megacore 'parallel' sharding on v7x."""
    step = CHUNK_ROWS if rows > 2 * CHUNK_ROWS else sub
    target = pl.cdiv(rows, 2)
    return max(step, min(MAX_BLOCK_ROWS, _round_up(target, step)))


def _vmem_limit(block_rows, in_itemsize, out_block_bytes):
    in_block = block_rows * LANE * in_itemsize
    need = 2 * 2 * in_block + 2 * out_block_bytes + (6 << 20)  # temps / headroom
    return int(min(max(need, 16 << 20), 48 << 20))


def general_robust_regression_loss(
    prediction, target, *, alpha=2.0, scale=1.0, max=None, reduction="mean"
):
    if scale <= 0:
        raise ValueError(f"scale has to be greater than 0 but received {scale}")
    if reduction not in ("mean", "sum", "none"):
        raise ValueError(f"invalid reduction: {reduction}")
    alpha = float(alpha)
    scale = float(scale)
    max_val = None if max is None else float(max)

    orig_shape = prediction.shape
    orig_dtype = prediction.dtype
    n = prediction.size

    if n == 0:
        if reduction == "none":
            return jnp.zeros(orig_shape, orig_dtype)
        total = jnp.zeros((), jnp.float32)
        if reduction == "mean":
            total = total / jnp.float32(n)
        return total.astype(orig_dtype)

    flat_pred = prediction.reshape(-1)
    flat_targ = target.reshape(-1)

    rows = n // LANE                # 128-aligned prefix handled by Pallas
    n_aligned = rows * LANE
    has_tail = n_aligned != n

    # <=127-element tail handled in plain jnp (avoids full-array pad/slice copies).
    tail_loss = None
    if has_tail:
        tail_loss = _barron_loss(
            flat_pred[n_aligned:].astype(jnp.float32)
            - flat_targ[n_aligned:].astype(jnp.float32),
            alpha, scale, max_val)

    if rows == 0:  # tiny input (< 128 elements): no Pallas
        if reduction == "none":
            return tail_loss.astype(orig_dtype).reshape(orig_shape)
        total = jnp.sum(tail_loss)
        if reduction == "mean":
            total = total / jnp.float32(n)
        return total.astype(orig_dtype)

    pred2d = (flat_pred[:n_aligned] if has_tail else flat_pred).reshape(rows, LANE)
    targ2d = (flat_targ[:n_aligned] if has_tail else flat_targ).reshape(rows, LANE)

    in_itemsize = pred2d.dtype.itemsize
    sub = {4: 8, 2: 16, 1: 32}.get(in_itemsize, 8)   # dtype-native sublane multiple
    block_rows = _pick_block_rows(rows, sub)
    chunk_rows = min(CHUNK_ROWS, block_rows)
    num_blocks = pl.cdiv(rows, block_rows)
    mask_rows = rows % block_rows != 0
    trans = _alpha_transcendentals(alpha)

    in_specs = [
        pl.BlockSpec((block_rows, LANE), lambda i: (i, 0)),
        pl.BlockSpec((block_rows, LANE), lambda i: (i, 0)),
    ]

    if reduction == "none":
        out_itemsize = jnp.dtype(orig_dtype).itemsize
        kernel = functools.partial(
            _elementwise_kernel, alpha=alpha, scale=scale, max_val=max_val,
            block_rows=block_rows, chunk_rows=chunk_rows)
        out2d = pl.pallas_call(
            kernel,
            out_shape=jax.ShapeDtypeStruct((rows, LANE), orig_dtype),
            grid=(num_blocks,),
            in_specs=in_specs,
            out_specs=pl.BlockSpec((block_rows, LANE), lambda i: (i, 0)),
            compiler_params=pltpu.CompilerParams(
                dimension_semantics=("parallel",),
                vmem_limit_bytes=_vmem_limit(
                    block_rows, in_itemsize, block_rows * LANE * out_itemsize)),
            cost_estimate=pl.CostEstimate(
                flops=6 * n_aligned,
                transcendentals=trans * n_aligned,
                bytes_accessed=(2 * in_itemsize + out_itemsize) * n_aligned),
        )(pred2d, targ2d)
        if not has_tail:
            return out2d.reshape(orig_shape)
        return jnp.concatenate(
            [out2d.reshape(-1), tail_loss.astype(orig_dtype)]).reshape(orig_shape)

    # sum / mean: fully parallel grid writing per-block (8,128) partial sums.
    kernel = functools.partial(
        _partial_sum_kernel, alpha=alpha, scale=scale, max_val=max_val,
        mask_rows=mask_rows, rows_valid=rows,
        block_rows=block_rows, chunk_rows=chunk_rows)
    partials = pl.pallas_call(
        kernel,
        out_shape=jax.ShapeDtypeStruct((num_blocks * 8, LANE), jnp.float32),
        grid=(num_blocks,),
        in_specs=in_specs,
        out_specs=pl.BlockSpec((8, LANE), lambda i: (i, 0)),
        compiler_params=pltpu.CompilerParams(
            dimension_semantics=("parallel",),
            vmem_limit_bytes=_vmem_limit(block_rows, in_itemsize, 8 * LANE * 4)),
        cost_estimate=pl.CostEstimate(
            flops=7 * n_aligned,
            transcendentals=trans * n_aligned,
            bytes_accessed=2 * in_itemsize * n_aligned + num_blocks * 8 * LANE * 4),
    )(pred2d, targ2d)

    total = jnp.sum(partials)
    if has_tail:
        total = total + jnp.sum(tail_loss)
    if reduction == "mean":
        total = total / jnp.float32(n)   # divide by valid element count
    return total.astype(orig_dtype)


class GeneralRobustRegressionLoss:
    """JAX/Pallas port of karbonn GeneralRobustRegressionLoss (Barron loss)."""

    def __init__(self, alpha=2.0, scale=1.0, max=None, reduction="mean"):
        self._alpha = float(alpha)
        if scale <= 0:
            raise ValueError(f"scale has to be greater than 0 but received {scale}")
        self._scale = float(scale)
        self._max = max
        if reduction not in ("mean", "sum", "none"):
            raise ValueError(f"invalid reduction: {reduction}")
        self.reduction = reduction

    def extra_repr(self):
        return (f"alpha={self._alpha}, scale={self._scale}, max={self._max}, "
                f"reduction={self.reduction}")

    def __call__(self, prediction, target):
        return general_robust_regression_loss(
            prediction, target, alpha=self._alpha, scale=self._scale,
            max=self._max, reduction=self.reduction)


def _reference(pred, targ, alpha, scale, max_val, reduction):
    """Pure-JAX reference matching the karbonn/PyTorch functional."""
    z2 = ((pred - targ) / scale) ** 2
    if alpha == 2.0:
        loss = 0.5 * z2
    elif alpha == 0.0:
        loss = jnp.log(0.5 * z2 + 1.0)
    else:
        beta = abs(alpha - 2.0)
        loss = (beta / alpha) * ((z2 / beta + 1.0) ** (alpha / 2.0) - 1.0)
    if max_val is not None:
        loss = jnp.minimum(loss, max_val)
    if reduction == "mean":
        return jnp.mean(loss)
    if reduction == "sum":
        return jnp.sum(loss)
    return loss


if __name__ == "__main__":
    key = jax.random.PRNGKey(0)
    k1, k2, k3, k4, k5, k6 = jax.random.split(key, 6)
    x = jax.random.normal(k1, (2, 4, 16, 16), dtype=jnp.float32)
    y = jax.random.uniform(k2, (2, 4, 16, 16), dtype=jnp.float32)

    # default config: alpha=2.0, scale=1.0, max=None, reduction='mean'
    criterion = GeneralRobustRegressionLoss()
    loss = criterion(x, y)
    jax.block_until_ready(loss)
    ref = _reference(x, y, 2.0, 1.0, None, "mean")
    assert jnp.allclose(loss, ref, rtol=1e-5, atol=1e-6), (loss, ref)

    # alpha=1 (sqrt fast path), clipping, sum reduction
    crit2 = GeneralRobustRegressionLoss(alpha=1.0, scale=0.5, max=2.0, reduction="sum")
    l2 = crit2(x, y)
    jax.block_until_ready(l2)
    ref2 = _reference(x, y, 1.0, 0.5, 2.0, "sum")
    assert jnp.allclose(l2, ref2, rtol=1e-4, atol=1e-4), (l2, ref2)

    # alpha=0 log path, reduction='none'
    crit3 = GeneralRobustRegressionLoss(alpha=0.0, scale=1.0, reduction="none")
    l3 = crit3(x, y)
    jax.block_until_ready(l3)
    ref3 = _reference(x, y, 0.0, 1.0, None, "none")
    assert l3.shape == x.shape
    assert jnp.allclose(l3, ref3, rtol=1e-5, atol=1e-6)

    # non-128-aligned size: exercises aligned-prefix + jnp-tail path, the
    # ragged-last-block row mask, and the half-integer power fast path (alpha=3).
    xa = jax.random.normal(k3, (10, 130), dtype=jnp.float32)
    ya = jax.random.normal(k4, (10, 130), dtype=jnp.float32)
    crit4 = GeneralRobustRegressionLoss(alpha=3.0, scale=1.5, reduction="mean")
    l4 = crit4(xa, ya)
    jax.block_until_ready(l4)
    ref4 = _reference(xa, ya, 3.0, 1.5, None, "mean")
    assert jnp.allclose(l4, ref4, rtol=1e-4, atol=1e-5), (l4, ref4)

    # negative integer alpha (reciprocal fast path), 'none' with non-aligned size
    crit5 = GeneralRobustRegressionLoss(alpha=-4.0, reduction="none")
    l5 = crit5(xa, ya)
    jax.block_until_ready(l5)
    ref5 = _reference(xa, ya, -4.0, 1.0, None, "none")
    assert l5.shape == xa.shape
    assert jnp.allclose(l5, ref5, rtol=1e-4, atol=1e-5)

    # medium size: exercises the multi-chunk in-kernel accumulation loops
    xb = jax.random.normal(k5, (512, 1024), dtype=jnp.float32)
    yb = jax.random.normal(k6, (512, 1024), dtype=jnp.float32)
    l6 = GeneralRobustRegressionLoss(reduction="mean")(xb, yb)
    jax.block_until_ready(l6)
    ref6 = _reference(xb, yb, 2.0, 1.0, None, "mean")
    assert jnp.allclose(l6, ref6, rtol=1e-4, atol=1e-5), (l6, ref6)
    l7 = GeneralRobustRegressionLoss(reduction="none")(xb, yb)
    jax.block_until_ready(l7)
    ref7 = _reference(xb, yb, 2.0, 1.0, None, "none")
    assert jnp.allclose(l7, ref7, rtol=1e-5, atol=1e-6)

    print("KERNEL_OK")
</pallas_src>

<mosaic_0001>
module attributes {stable_mosaic.version = 11 : i64} {
  func.func @_partial_sum_kernel(%arg0: i32, %arg1: memref<8x128xf32, #tpu.memory_space<vmem>>, %arg2: memref<8x128xf32, #tpu.memory_space<vmem>>, %arg3: memref<8x128xf32, #tpu.memory_space<vmem>>) attributes {dimension_semantics = [#tpu.dimension_semantics<parallel>], iteration_bounds = array<i64: 2>, scalar_prefetch = 0 : i64, scratch_operands = 0 : i64, tpu.core_type = #tpu.core_type<tc>, window_params = [{transform_indices = @transform_0, window_bounds = array<i64: 8, 128>}, {transform_indices = @transform_1, window_bounds = array<i64: 8, 128>}, {transform_indices = @transform_2, window_bounds = array<i64: 8, 128>}]} {
    %c0 = arith.constant 0 : index
    %c0_0 = arith.constant 0 : index
    %0 = vector.load %arg1[%c0, %c0_0] : memref<8x128xf32, #tpu.memory_space<vmem>>, vector<8x128xf32>
    %c0_1 = arith.constant 0 : index
    %c0_2 = arith.constant 0 : index
    %1 = vector.load %arg2[%c0_1, %c0_2] : memref<8x128xf32, #tpu.memory_space<vmem>>, vector<8x128xf32>
    %2 = arith.subf %0, %1 : vector<8x128xf32>
    %cst = arith.constant 1.000000e+00 : f32
    %3 = vector.broadcast %cst : f32 to vector<8x128xf32>
    %4 = arith.mulf %2, %3 : vector<8x128xf32>
    %5 = arith.mulf %4, %4 : vector<8x128xf32>
    %cst_3 = arith.constant 5.000000e-01 : f32
    %6 = vector.broadcast %cst_3 : f32 to vector<8x128xf32>
    %7 = arith.mulf %6, %5 : vector<8x128xf32>
    %8 = vector.shape_cast %7 : vector<8x128xf32> to vector<1x8x128xf32>
    %cst_4 = arith.constant dense<0.000000e+00> : vector<8x128xf32>
    %9 = vector.multi_reduction <add>, %8, %cst_4 [0] : vector<1x8x128xf32> to vector<8x128xf32>
    %c0_5 = arith.constant 0 : index
    %c0_6 = arith.constant 0 : index
    %10 = vector.load %arg3[%c0_5, %c0_6] : memref<8x128xf32, #tpu.memory_space<vmem>>, vector<8x128xf32>
    tpu.vector_store %arg3[%c0_5, %c0_6], %9 {strides = array<i32>} : memref<8x128xf32, #tpu.memory_space<vmem>>, vector<8x128xf32>,
    return
  }
  func.func @transform_0(%arg0: i32) -> (i32, i32) {
    %c0_i32 = arith.constant 0 : i32
    %c0_i32_0 = arith.constant 0 : i32
    return %arg0, %c0_i32 : i32, i32
  }
  func.func @transform_1(%arg0: i32) -> (i32, i32) {
    %c0_i32 = arith.constant 0 : i32
    %c0_i32_0 = arith.constant 0 : i32
    return %arg0, %c0_i32 : i32, i32
  }
  func.func @transform_2(%arg0: i32) -> (i32, i32) {
    %c0_i32 = arith.constant 0 : i32
    %c0_i32_0 = arith.constant 0 : i32
    return %arg0, %c0_i32 : i32, i32
  }
}

</mosaic_0001>

<bundles_post_ra>
// kernel: tpu_custom_call.1
= control target key start
LH: loop header
LB: loop body
LE: loop exit
PB: predicated region body
PF: predicated region fallthrough
CT: control target
= control target key end

     0   :  { %7 = vsyncpa [#allocation3], 0  ;;  %s735_s0 = inlined_call_operand.hbm [shape: f32[16,128], index: 0, kind: input, shape index: {}]   ;;  %s736_s1 = inlined_call_operand.hbm [shape: f32[16,128], index: 1, kind: input, shape index: {}]   ;;  %s737_s2 = inlined_call_operand.hbm [shape: f32[16,128], index: 2, kind: output, shape index: {}]  }
   0x1   :  { %9 = vsyncpa [#allocation3 + $0x1], 0 }
   0x2   :  { %10 = vsyncpa [#allocation6], 0 }
   0x3   :  { %12 = vsyncpa [#allocation6 + $0x1], 0 }
   0x4   :  { %13 = vsyncpa [#allocation4], 0 }
   0x5   :  { %15 = vsyncpa [#allocation4 + $0x1], 0  ;;  %s526_s9 = smov 0   ;;  %s528_s10 = smov 0  }
   0x6   :  { %s530_s11 = smov 0   ;;  %s532_s12 = smov 0  }
   0x7 LB: > { %s547_s13 = sadd.s32 4294967295, %s506_s12   ;;  %s310_s14 = sadd.s32 4294967294, %s506_s12   ;;  %s506_s12 = sphi %s532_s12, %s756_s12   ;;  %s502_s11 = sphi %s530_s11, %s755_s11   ;;  %s498_s10 = sphi %s528_s10, %s754_s10   ;;  %s494_s9 = sphi %s526_s9, %s753_s9  }
   0x8   : > { %s551_s15 = sadd.s32 1, %s506_s12   ;;  %s28_s16 = sadd.s32 1, %s502_s11 }
   0x9   : > { %s25_s17 = ssub.s32 %s506_s12, %s551_s15  ;;  %p35_p0 = scmp.ne.s32.totalorder %s502_s11, %s498_s10 }
   0xa   : > { %p26_p1 = scmp.eq.s32.totalorder %s25_s17, 0  ;;  %p36_p2 = scmp.eq.s32.totalorder %s506_s12, 0 }
   0xb   : > { %p41_p3 = scmp.ne.s32.totalorder %s498_s10, %s494_s9  ;;  %p42_p4 = scmp.eq.s32.totalorder %s547_s13, 0 }
   0xc   : > { %s563_s18 = scalar_select %p26_p1, %s502_s11, %s28_s16  }
   0xd   : > { %p565_p5 = por %p36_p2, %p35_p0  ;;  %p569_p6 = por %p42_p4, %p41_p3 }
   0xe   : > { %p91_p7 = scmp.eq.s32.totalorder %s547_s13, 1  ;;  %p97_p8 = scmp.eq.s32.totalorder %s310_s14, 1 }
   0xf   : > { %s741_s20 = scalar_select %p569_p6, 1, 0 }
  0x10   : > { %p342_p10 = scmp.lt.s32.totalorder %s506_s12, 2  ;;  %p576_p11 = por %p91_p7, %p35_p0 }
  0x11   : > { %p580_p12 = por %p97_p8, %p41_p3  ;;  %s585_s23 = sand.u32 1, %s502_s11  }
  0x12   : > { %s742_s21 = scalar_select %p576_p11, 1, 0 }
  0x13   : > { %s743_s22 = scalar_select %p580_p12, 1, 0 }
  0x14   : > { %s314_s24 = sshll.u32 %s506_s12, 7  ;;  %s313_s25 = sshll.u32 %s585_s23, 3 }
  0x15   : > { %s594_s28 = scalar_lea.hbm %s735_s0, %s314_s24  ;;  %s121_s29 = scalar_lea.vmem [#allocation2], %s313_s25 }
  0x16   : > { %s128_s30 = sshll.u32 %s121_s29, 4  ;;  %p600_p13 = pnand %p342_p10, %p565_p5  ;;  %s604_s30 = int_to_ptr.vmem [resolvable:$true] %s128_s30 }
  0x17   : > { %s118_s4 = scalar_lea.sflag [#allocation3], %s585_s23  ;;  %s376_s5 = scalar_lea.hbm %s594_s28, 128 }
  0x18   : > { %p377_p2 = scmp.ne.s32.totalorder %s594_s28, %s376_s5  ;;  %p378_p3 = pneg %p600_p13 }
  0x19   : > { %s381_s8 = scalar_lea.hbm %s735_s0, 256  ;;  %p382_p5 = scmp.lt.u32.totalorder %s594_s28, %s735_s0 }
  0x1a   : > { %p379_p4 = pnand %p378_p3, %p377_p2  ;;  %p383_p8 = scmp.lt.u32.totalorder %s381_s8, %s376_s5 }
  0x1b   : > { %p385_p9 = scmp.lt.u32.totalorder %s376_s5, %s594_s28 }
  0x1c   : > { %p380_p7 = pneg %p379_p4  ;;  %p384_p10 = por %p383_p8, %p382_p5 }
  0x1e   : > { %p386_p0 = por %p385_p9, %p384_p10 }
  0x20   : > { %p387_p1 = pnand %p386_p0, %p380_p7 }
  0x22   : > { %390 = shalt.err (!%p387_p1)
}
  0x23   : > { %s391_s17 = scalar_lea.vmem %s604_s30, 128  ;;  %s508_s19 = smov [#allocation2]  }
  0x24   : > { %p392_p2 = scmp.ne.s32.totalorder %s604_s30, %s391_s17  ;;  %s396_s26 = sshll.u32 %s508_s19, 4  ;;  %s397_s26 = int_to_ptr.vmem [resolvable:$false] %s396_s26 }
  0x25   : > { %s398_s27 = scalar_lea.vmem %s397_s26, 256  ;;  %p399_p11 = scmp.lt.s32.totalorder %s604_s30, %s397_s26 }
  0x26   : > { %p394_p4 = pnand %p392_p2, %p378_p3  ;;  %p400_p5 = scmp.lt.s32.totalorder %s398_s27, %s391_s17 }
  0x28   : > { %p395_p12 = pneg %p394_p4  ;;  %p401_p8 = por %p400_p5, %p399_p11 }
  0x2a   : > { %p402_p9 = pnand %p401_p8, %p395_p12 }
  0x2c   : > { %405 = shalt.err (!%p402_p9)
}
  0x2d   : > { %334 = dma.hbm_to_vmem [thread:$0]  (!%p600_p13), %s594_s28, 128, %s604_s30, %s118_s4  }
  0x2e   : > { %p745_p0 = scmp.lt.s32.totalorder %s506_s12, 3  ;;  %p746_p1 = scmp.ge.s32.totalorder %s506_s12, 1 }
  0x2f   : > { %s647_s7 = scalar_lea.hbm %s736_s1, %s314_s24  ;;  %s139_s8 = scalar_lea.vmem [#allocation5], %s313_s25 }
  0x30   : > { %p638_p7 = pnand %p746_p1, %p745_p0  ;;  %s146_s14 = sshll.u32 %s139_s8, 4  ;;  %s147_s14 = int_to_ptr.vmem [resolvable:$true] %s146_s14 }
  0x31   : > { %s136_s28 = scalar_lea.sflag [#allocation6], %s585_s23  ;;  %s406_s30 = scalar_lea.hbm %s647_s7, 128 }
  0x32   : > { %s747_s29 = scalar_select %p638_p7, 1, 0 }
  0x33   : > { %p407_p11 = scmp.ne.s32.totalorder %s647_s7, %s406_s30  ;;  %s411_s24 = scalar_lea.hbm %s736_s1, 256 }
  0x34   : > { %p412_p2 = scmp.lt.u32.totalorder %s647_s7, %s736_s1  ;;  %p413_p4 = scmp.lt.u32.totalorder %s411_s24, %s406_s30 }
  0x35   : > { %p409_p12 = pnand %p407_p11, %p378_p3  ;;  %p415_p8 = scmp.lt.u32.totalorder %s406_s30, %s647_s7 }
  0x36   : > { %p414_p5 = por %p413_p4, %p412_p2 }
  0x37   : > { %p410_p10 = pneg %p409_p12 }
  0x38   : > { %p416_p9 = por %p415_p8, %p414_p5 }
  0x3a   : > { %p417_p0 = pnand %p416_p9, %p410_p10 }
  0x3c   : > { %420 = shalt.err (!%p417_p0)
}
  0x3d   : > { %s421_s23 = scalar_lea.vmem %s147_s14, 128  ;;  %s509_s25 = smov [#allocation5]  }
  0x3e   : > { %p422_p1 = scmp.ne.s32.totalorder %s147_s14, %s421_s23  ;;  %s426_s26 = sshll.u32 %s509_s25, 4  ;;  %s427_s26 = int_to_ptr.vmem [resolvable:$false] %s426_s26 }
  0x3f   : > { %s428_s27 = scalar_lea.vmem %s427_s26, 256  ;;  %p429_p6 = scmp.lt.s32.totalorder %s147_s14, %s427_s26 }
  0x40   : > { %p424_p11 = pnand %p422_p1, %p378_p3  ;;  %p430_p7 = scmp.lt.s32.totalorder %s428_s27, %s421_s23 }
  0x42   : > { %p425_p12 = pneg %p424_p11  ;;  %p431_p2 = por %p430_p7, %p429_p6 }
  0x44   : > { %p432_p4 = pnand %p431_p2, %p425_p12 }
  0x46   : > { %435 = shalt.err (!%p432_p4)
}
  0x47   : > { %337 = dma.hbm_to_vmem [thread:$0]  (!%p600_p13), %s647_s7, 128, %s147_s14, %s136_s28  }
  0x48   : > { %p748_p10 = scmp.ne.s32.totalorder %s747_s29, 0 }
  0x49   : > { %s674_s5 = sand.u32 (!%p748_p10), 1, %s498_s10   ;;  %p749_p3 = scmp.ne.s32.totalorder (!%p748_p10), %s741_s20, 0 }
  0x4a   : > { %155 = sbr.rel (%p748_p10) target bundleno = 110 (0x6e), region = 28  ;;  %s318_s6 = sshll.u32 (!%p748_p10), %s674_s5, 3 }
  0x4b   : > { %s158_s8 = scalar_lea.sflag (!%p748_p10), [#allocation3], %s674_s5  ;;  %s161_s30 = scalar_lea.vmem (!%p748_p10), [#allocation2], %s318_s6 }
  0x51   : > { %481 = dma.done.wait (%p749_p3), %s158_s8, 128  }
  0x52   : > { %483 = vsyncadd (%p749_p3), %s158_s8, 4294967168  ;;  %s167_s3 = scalar_lea.sflag [#allocation6], %s674_s5  ;;  %s170_s7 = scalar_lea.vmem [#allocation5], %s318_s6 }
  0x53   : > { %485 = dma.done.wait (%p749_p3), %s167_s3, 128  }
  0x54   : > { %487 = vsyncadd (%p749_p3), %s167_s3, 4294967168  ;;  %v196_v0 = vld [vmem:[%s161_s30] sm:$0xff]  ;;  %v197_v1 = vld [vmem:[%s170_s7] sm:$0xff]  ;;  %s195_s29 = scalar_lea.vmem [#allocation7], %s318_s6  ;;  %s322_s28 = sshll.u32 %s547_s13, 7 }
  0x55   : > { %v198_v2 = vsub.f32 %v196_v0, %v197_v1  ;;  %s217_s14 = sshll.u32 %s195_s29, 4  ;;  %s693_s20 = scalar_lea.hbm %s737_s2, %s322_s28  ;;  %s688_s14 = int_to_ptr.vmem [resolvable:$true] %s217_s14 }
  0x56   : > { %s204_s24 = scalar_lea.sflag [#allocation4], %s674_s5  ;;  %s436_s17 = scalar_lea.vmem %s688_s14, 128 }
  0x57   : > { %v199_v3 = vmul.f32 %v198_v2, %v198_v2  ;;  %p437_p6 = scmp.ne.s32.totalorder %s688_s14, %s436_s17  ;;  %p750_p13 = scmp.ne.s32.totalorder %s742_s21, 0 }
  0x58   : > { %s510_s13 = smov [#allocation7]  }
  0x59   : > { %v200_v4 = vmul.f32 0.5, %v199_v3  ;;  %p438_p7 = pnand %p437_p6, %p750_p13  ;;  %s440_s19 = sshll.u32 %s510_s13, 4  ;;  %s441_s19 = int_to_ptr.vmem [resolvable:$false] %s440_s19 }
  0x5a   : > { %s442_s23 = scalar_lea.vmem %s441_s19, 256  ;;  %p443_p8 = scmp.lt.s32.totalorder %s688_s14, %s441_s19 }
  0x5b   : > { %202 = vst [vmem:[%s195_s29] sm:$0xff] %v200_v4  ;;  %p439_p5 = pneg %p438_p7  ;;  %p444_p9 = scmp.lt.s32.totalorder %s442_s23, %s436_s17 }
  0x5d   : > { %p445_p0 = por %p444_p9, %p443_p8 }
  0x5f   : > { %p446_p1 = pnand %p445_p0, %p439_p5 }
  0x61   : > { %449 = shalt.err (!%p446_p1)
}
  0x62   : > { %s450_s25 = scalar_lea.hbm %s693_s20, 128  ;;  %s454_s5 = scalar_lea.hbm %s737_s2, 256 }
  0x63   : > { %p451_p11 = scmp.ne.s32.totalorder %s693_s20, %s450_s25  ;;  %p455_p4 = scmp.lt.u32.totalorder %s693_s20, %s737_s2 }
  0x64   : > { %p456_p10 = scmp.lt.u32.totalorder %s454_s5, %s450_s25  ;;  %p458_p6 = scmp.lt.u32.totalorder %s450_s25, %s693_s20 }
  0x65   : > { %p452_p12 = pnand %p451_p11, %p750_p13 }
  0x66   : > { %p457_p3 = por %p456_p10, %p455_p4 }
  0x67   : > { %p453_p2 = pneg %p452_p12 }
  0x68   : > { %p459_p7 = por %p458_p6, %p457_p3 }
  0x6a   : > { %p460_p5 = pnand %p459_p7, %p453_p2 }
  0x6c   : > { %463 = shalt.err (!%p460_p5)
}
  0x6d   : > { %329 = dma.vmem_to_hbm [thread:$0]  (%p750_p13), %s688_s14, 128, %s693_s20, %s204_s24  }
  0x6e PF: > { %s229_s30 = sand.u32 1, %s494_s9   ;;  %p751_p8 = scmp.ne.s32.totalorder %s743_s22, 0 }
  0x6f   : > { %p752_p9 = scmp.ge.s32.totalorder %s506_s12, 2  ;;  %s230_s3 = scalar_lea.sflag [#allocation4], %s229_s30 }
  0x71   : > { %p339_p0 = pnand %p752_p9, %p751_p8 }
  0x73   : > { %489 = dma.done.wait (!%p339_p0), %s230_s3, 128  }
  0x74   : > { %491 = vsyncadd (!%p339_p0), %s230_s3, 4294967168  ;;  %p18_p1 = scmp.ge.s32.totalorder %s551_s15, 4   ;;  %s753_s9 = smov %s498_s10 }
  0x75   : > { %s754_s10 = smov %s502_s11  ;;  %s755_s11 = smov %s563_s18 }
  0x76   : > { %s756_s12 = smov %s551_s15  ;;  %20 = sbr.rel (!%p18_p1) target bundleno = 7 (0x7), region = 86 }
  0x7d   :  { %235 = vsyncpa [#allocation3], 1 }
  0x7e   :  { %237 = vsyncpa [#allocation3 + $0x1], 1 }
  0x7f   :  { %238 = vsyncpa [#allocation6], 1 }
  0x80   :  { %240 = vsyncpa [#allocation6 + $0x1], 1 }
  0x81   :  { %241 = vsyncpa [#allocation4], 1 }
  0x82   :  { %243 = vsyncpa [#allocation4 + $0x1], 1 }

</bundles_post_ra>
